<compile_context>
chip_gen: v5e
topology: v5e:2x2
jax: 0.10.0
libtpu: 0.0.40
codegen_flags: <defaults>
</compile_context>

<pallas_src>
import functools
import math

import jax
import jax.numpy as jnp
from jax.experimental import pallas as pl
from jax.experimental.pallas import tpu as pltpu

_HALF_LOG_2PI = 0.5 * math.log(2.0 * math.pi)


def gm_kernel(x_ref, wp2_ref, wp1_ref, bp_ref, wg2_ref, wg1_ref, bg_ref,
              v1_ref, v2_ref, p_ref, dpdx_ref, *, inv_n):
    """One tile of TN rows: p (TN, Gp) and dpdx (TN, D), all reductions on the MXU."""
    dotf = functools.partial(jnp.dot,
                             preferred_element_type=jnp.float32,
                             precision=jax.lax.Precision.HIGHEST)

    x = x_ref[...]                    # (TN, D) f32
    x2 = x * x                        # (TN, D)

    # p = log(pi) + sum_d (x - mu)^2 / sig  (expanded quadratic, all constants hoisted)
    p = dotf(x2, wp2_ref[...]) + dotf(x, wp1_ref[...]) + bp_ref[...]      # (TN, Gp)
    p_ref[...] = p.astype(p_ref.dtype)

    # GMM log joint per gaussian (padded columns carry a -1e30 bias -> exp() == 0)
    g_log = dotf(x2, wg2_ref[...]) + dotf(x, wg1_ref[...]) + bg_ref[...]  # (TN, Gp)
    m = jnp.max(g_log, axis=-1, keepdims=True)                            # (TN, 1)
    e = jnp.exp(g_log - m)
    denom = jnp.sum(e, axis=-1, keepdims=True)
    resp = e / denom                                                      # (TN, Gp)

    # dLoss/dx = (1/N) * sum_g resp_g * (x - mu_g) / sig_g^2
    s1 = dotf(resp, v1_ref[...])      # (TN, D) = resp @ inv_var
    s2 = dotf(resp, v2_ref[...])      # (TN, D) = resp @ (mu * inv_var)
    dpdx_ref[...] = (inv_n * (x * s1 - s2)).astype(dpdx_ref.dtype)


def _round_up(a, m):
    return ((a + m - 1) // m) * m


def gm_forward(x, Pis, Sigs, Mus, *, tile_n=512):
    """Eval-mode GM.forward: returns (p, dpdx)."""
    N, D = x.shape
    G = Pis.shape[1]
    f32 = jnp.float32

    # ---- Parameter "glue" (matches GM.params()), all grid-invariant ----------
    pi = jax.nn.softmax(Pis.astype(f32), axis=1)          # (1, G)
    logpi = jnp.log(pi)[0]                                # (G,)
    sig = jnp.exp(Sigs.astype(f32))[0]                    # (G, D)
    mu = Mus.astype(f32)[0]                               # (G, D)
    inv_sig = 1.0 / sig
    inv_var = inv_sig * inv_sig
    log_sig_sum = jnp.sum(Sigs.astype(f32)[0], axis=-1)   # sum_d log(sig) == sum_d Sigs

    # Lane-dense gaussian axis: pad G up to a multiple of 128.
    Gp = _round_up(max(G, 1), 128)

    def pad_cols(w):   # (D, G) -> (D, Gp)
        return jnp.pad(w, ((0, 0), (0, Gp - G)))

    def pad_rows(w):   # (G, D) -> (Gp, D)
        return jnp.pad(w, ((0, Gp - G), (0, 0)))

    # p = x2 @ inv_sig^T  +  x @ (-2 mu inv_sig)^T  +  [logpi + sum_d mu^2 inv_sig]
    wp2 = pad_cols(inv_sig.T)
    wp1 = pad_cols((-2.0 * mu * inv_sig).T)
    bp = jnp.pad(logpi + jnp.sum(mu * mu * inv_sig, axis=-1), (0, Gp - G))[None, :]

    # g_log = x2 @ (-0.5 inv_var)^T + x @ (mu inv_var)^T
    #         + [logpi - 0.5 sum_d mu^2 inv_var - sum_d log sig - D/2 log 2pi]
    wg2 = pad_cols((-0.5 * inv_var).T)
    wg1 = pad_cols((mu * inv_var).T)
    bg_real = (logpi - 0.5 * jnp.sum(mu * mu * inv_var, axis=-1)
               - log_sig_sum - D * _HALF_LOG_2PI)
    bg = jnp.pad(bg_real, (0, Gp - G), constant_values=-1e30)[None, :]

    v1 = pad_rows(inv_var)           # (Gp, D)
    v2 = pad_rows(mu * inv_var)      # (Gp, D)

    # ---- Tile selection -------------------------------------------------------
    tile = max(8, (int(tile_n) // 8) * 8)
    tile = min(tile, _round_up(N, 8))
    # Keep >= 2 grid steps when possible (v7x has 2 TensorCores per chip).
    if pl.cdiv(N, tile) < 2 and N > 8:
        tile = _round_up(pl.cdiv(N, 2), 8)
    # Budget ~24 MiB for double-buffered x / p / dpdx tiles (fits v5e/v6e/v7x scoped VMEM).
    budget = 24 * 1024 * 1024
    while tile > 8 and 2 * 4 * tile * (2 * D + Gp) > budget:
        tile = max(8, ((tile // 2) // 8) * 8)

    n_pad = _round_up(N, tile)
    xp = x.astype(f32)
    if n_pad != N:
        xp = jnp.pad(xp, ((0, n_pad - N), (0, 0)))

    kernel = functools.partial(gm_kernel, inv_n=1.0 / N)

    p_pad, dpdx_pad = pl.pallas_call(
        kernel,
        out_shape=(jax.ShapeDtypeStruct((n_pad, Gp), f32),
                   jax.ShapeDtypeStruct((n_pad, D), f32)),
        grid_spec=pltpu.PrefetchScalarGridSpec(
            num_scalar_prefetch=0,
            grid=(n_pad // tile,),
            in_specs=[
                pl.BlockSpec((tile, D), lambda i: (i, 0)),   # x tile
                pl.BlockSpec((D, Gp), lambda i: (0, 0)),     # wp2 (replicated)
                pl.BlockSpec((D, Gp), lambda i: (0, 0)),     # wp1
                pl.BlockSpec((1, Gp), lambda i: (0, 0)),     # bp
                pl.BlockSpec((D, Gp), lambda i: (0, 0)),     # wg2
                pl.BlockSpec((D, Gp), lambda i: (0, 0)),     # wg1
                pl.BlockSpec((1, Gp), lambda i: (0, 0)),     # bg
                pl.BlockSpec((Gp, D), lambda i: (0, 0)),     # inv_var
                pl.BlockSpec((Gp, D), lambda i: (0, 0)),     # mu*inv_var
            ],
            out_specs=[
                pl.BlockSpec((tile, Gp), lambda i: (i, 0)),  # p tile (lane-dense)
                pl.BlockSpec((tile, D), lambda i: (i, 0)),   # dpdx tile
            ],
        ),
        compiler_params=pltpu.CompilerParams(
            dimension_semantics=("parallel",),
            vmem_limit_bytes=32 * 1024 * 1024,
        ),
    )(xp, wp2, wp1, bp, wg2, wg1, bg, v1, v2)

    return p_pad[:N, :G], dpdx_pad[:N]


def ref_forward(x, Pis, Sigs, Mus):
    """Pure-JAX reference mirroring the PyTorch code (for validation)."""
    pi = jax.nn.softmax(Pis, axis=1)    # (1, G)
    sig = jnp.exp(Sigs)                 # (1, G, D)
    mu = Mus                            # (1, G, D)

    xe = x[:, None, :]                                       # (N, 1, D)
    mal = jnp.sum((xe - mu) ** 2 / sig, axis=-1)             # (N, G)
    p = jnp.log(pi) + mal                                    # (N, G)

    def loss_fn(xx):
        xb = xx[:, None, :]
        lp = (-0.5 * (xb - mu) ** 2 / (sig ** 2)
              - jnp.log(sig) - _HALF_LOG_2PI)                # (N, G, D)
        g = jnp.log(pi) + jnp.sum(lp, axis=-1)               # (N, G)
        m = jnp.max(g, axis=-1, keepdims=True)
        log_prob = m[:, 0] + jnp.log(jnp.sum(jnp.exp(g - m), axis=-1))
        return -jnp.mean(log_prob)

    dpdx = jax.grad(loss_fn)(x)
    return p, dpdx


if __name__ == "__main__":
    N, D, G = 16, 8, 4   # batch, inputs, gaussians

    key = jax.random.PRNGKey(0)
    kx, kp, ks, km = jax.random.split(key, 4)
    x = jax.random.normal(kx, (N, D), dtype=jnp.float32)
    # Deterministic "randn" parameter init (matches nn.Parameter(torch.randn(...)) shapes)
    Pis = jax.random.normal(kp, (1, G), dtype=jnp.float32)
    Sigs = jax.random.normal(ks, (1, G, D), dtype=jnp.float32)
    Mus = jax.random.normal(km, (1, G, D), dtype=jnp.float32)

    p, dpdx = gm_forward(x, Pis, Sigs, Mus)
    p = jax.block_until_ready(p)
    dpdx = jax.block_until_ready(dpdx)

    p_ref, dpdx_ref = ref_forward(x, Pis, Sigs, Mus)
    assert p.shape == (N, G) and dpdx.shape == (N, D)
    assert jnp.allclose(p, p_ref, atol=1e-3, rtol=1e-4), "p mismatch"
    assert jnp.allclose(dpdx, dpdx_ref, atol=1e-4, rtol=1e-3), "dpdx mismatch"

    print("KERNEL_OK")
</pallas_src>

<mosaic_0001>
module attributes {stable_mosaic.version = 11 : i64} {
  func.func @gm_kernel(%arg0: i32, %arg1: memref<8x8xf32, #tpu.memory_space<vmem>>, %arg2: memref<8x128xf32, #tpu.memory_space<vmem>>, %arg3: memref<8x128xf32, #tpu.memory_space<vmem>>, %arg4: memref<1x128xf32, #tpu.memory_space<vmem>>, %arg5: memref<8x128xf32, #tpu.memory_space<vmem>>, %arg6: memref<8x128xf32, #tpu.memory_space<vmem>>, %arg7: memref<1x128xf32, #tpu.memory_space<vmem>>, %arg8: memref<128x8xf32, #tpu.memory_space<vmem>>, %arg9: memref<128x8xf32, #tpu.memory_space<vmem>>, %arg10: memref<8x128xf32, #tpu.memory_space<vmem>>, %arg11: memref<8x8xf32, #tpu.memory_space<vmem>>) attributes {dimension_semantics = [#tpu.dimension_semantics<parallel>], iteration_bounds = array<i64: 2>, scalar_prefetch = 0 : i64, scratch_operands = 0 : i64, tpu.core_type = #tpu.core_type<tc>, window_params = [{transform_indices = @transform_0, window_bounds = array<i64: 8, 8>}, {pipeline_mode = #tpu.pipeline_mode<synchronous>, transform_indices = @transform_1, window_bounds = array<i64: 8, 128>}, {pipeline_mode = #tpu.pipeline_mode<synchronous>, transform_indices = @transform_2, window_bounds = array<i64: 8, 128>}, {pipeline_mode = #tpu.pipeline_mode<synchronous>, transform_indices = @transform_3, window_bounds = array<i64: 1, 128>}, {pipeline_mode = #tpu.pipeline_mode<synchronous>, transform_indices = @transform_4, window_bounds = array<i64: 8, 128>}, {pipeline_mode = #tpu.pipeline_mode<synchronous>, transform_indices = @transform_5, window_bounds = array<i64: 8, 128>}, {pipeline_mode = #tpu.pipeline_mode<synchronous>, transform_indices = @transform_6, window_bounds = array<i64: 1, 128>}, {pipeline_mode = #tpu.pipeline_mode<synchronous>, transform_indices = @transform_7, window_bounds = array<i64: 128, 8>}, {pipeline_mode = #tpu.pipeline_mode<synchronous>, transform_indices = @transform_8, window_bounds = array<i64: 128, 8>}, {transform_indices = @transform_9, window_bounds = array<i64: 8, 128>}, {transform_indices = @transform_10, window_bounds = array<i64: 8, 8>}]} {
    %c0 = arith.constant 0 : index
    %c0_0 = arith.constant 0 : index
    %0 = vector.load %arg1[%c0, %c0_0] : memref<8x8xf32, #tpu.memory_space<vmem>>, vector<8x8xf32>
    %1 = arith.mulf %0, %0 : vector<8x8xf32>
    %c0_1 = arith.constant 0 : index
    %c0_2 = arith.constant 0 : index
    %2 = vector.load %arg2[%c0_1, %c0_2] : memref<8x128xf32, #tpu.memory_space<vmem>>, vector<8x128xf32>
    %cst = arith.constant dense<0.000000e+00> : vector<8x128xf32>
    %3 = tpu.matmul %1, %2, %cst {dimension_numbers = #tpu.dot_dimension_numbers<[1], [0], [0], [1], [0, 0, 1, 1], [], []>, precision = #tpu.contract_precision<fp32>} : vector<8x8xf32>, vector<8x128xf32>, vector<8x128xf32> -> vector<8x128xf32>
    %c0_3 = arith.constant 0 : index
    %c0_4 = arith.constant 0 : index
    %4 = vector.load %arg3[%c0_3, %c0_4] : memref<8x128xf32, #tpu.memory_space<vmem>>, vector<8x128xf32>
    %cst_5 = arith.constant dense<0.000000e+00> : vector<8x128xf32>
    %5 = tpu.matmul %0, %4, %cst_5 {dimension_numbers = #tpu.dot_dimension_numbers<[1], [0], [0], [1], [0, 0, 1, 1], [], []>, precision = #tpu.contract_precision<fp32>} : vector<8x8xf32>, vector<8x128xf32>, vector<8x128xf32> -> vector<8x128xf32>
    %6 = arith.addf %3, %5 : vector<8x128xf32>
    %c0_6 = arith.constant 0 : index
    %c0_7 = arith.constant 0 : index
    %7 = vector.load %arg4[%c0_6, %c0_7] : memref<1x128xf32, #tpu.memory_space<vmem>>, vector<1x128xf32>
    %8 = vector.broadcast %7 : vector<1x128xf32> to vector<8x128xf32>
    %9 = arith.addf %6, %8 : vector<8x128xf32>
    %c0_8 = arith.constant 0 : index
    %c0_9 = arith.constant 0 : index
    %10 = vector.load %arg10[%c0_8, %c0_9] : memref<8x128xf32, #tpu.memory_space<vmem>>, vector<8x128xf32>
    tpu.vector_store %arg10[%c0_8, %c0_9], %9 {strides = array<i32>} : memref<8x128xf32, #tpu.memory_space<vmem>>, vector<8x128xf32>,
    %c0_10 = arith.constant 0 : index
    %c0_11 = arith.constant 0 : index
    %11 = vector.load %arg5[%c0_10, %c0_11] : memref<8x128xf32, #tpu.memory_space<vmem>>, vector<8x128xf32>
    %cst_12 = arith.constant dense<0.000000e+00> : vector<8x128xf32>
    %12 = tpu.matmul %1, %11, %cst_12 {dimension_numbers = #tpu.dot_dimension_numbers<[1], [0], [0], [1], [0, 0, 1, 1], [], []>, precision = #tpu.contract_precision<fp32>} : vector<8x8xf32>, vector<8x128xf32>, vector<8x128xf32> -> vector<8x128xf32>
    %c0_13 = arith.constant 0 : index
    %c0_14 = arith.constant 0 : index
    %13 = vector.load %arg6[%c0_13, %c0_14] : memref<8x128xf32, #tpu.memory_space<vmem>>, vector<8x128xf32>
    %cst_15 = arith.constant dense<0.000000e+00> : vector<8x128xf32>
    %14 = tpu.matmul %0, %13, %cst_15 {dimension_numbers = #tpu.dot_dimension_numbers<[1], [0], [0], [1], [0, 0, 1, 1], [], []>, precision = #tpu.contract_precision<fp32>} : vector<8x8xf32>, vector<8x128xf32>, vector<8x128xf32> -> vector<8x128xf32>
    %15 = arith.addf %12, %14 : vector<8x128xf32>
    %c0_16 = arith.constant 0 : index
    %c0_17 = arith.constant 0 : index
    %16 = vector.load %arg7[%c0_16, %c0_17] : memref<1x128xf32, #tpu.memory_space<vmem>>, vector<1x128xf32>
    %17 = vector.broadcast %16 : vector<1x128xf32> to vector<8x128xf32>
    %18 = arith.addf %15, %17 : vector<8x128xf32>
    %cst_18 = arith.constant dense<0xFF800000> : vector<8xf32>
    %19 = vector.multi_reduction <maximumf>, %18, %cst_18 [1] : vector<8x128xf32> to vector<8xf32>
    %20 = vector.shape_cast %19 : vector<8xf32> to vector<8x1xf32>
    %21 = vector.broadcast %20 : vector<8x1xf32> to vector<8x128xf32>
    %22 = arith.subf %18, %21 : vector<8x128xf32>
    %23 = math.exp %22 : vector<8x128xf32>
    %cst_19 = arith.constant dense<0.000000e+00> : vector<8xf32>
    %24 = vector.multi_reduction <add>, %23, %cst_19 [1] : vector<8x128xf32> to vector<8xf32>
    %25 = vector.shape_cast %24 : vector<8xf32> to vector<8x1xf32>
    %26 = vector.broadcast %25 : vector<8x1xf32> to vector<8x128xf32>
    %27 = arith.divf %23, %26 : vector<8x128xf32>
    %c0_20 = arith.constant 0 : index
    %c0_21 = arith.constant 0 : index
    %28 = vector.load %arg8[%c0_20, %c0_21] : memref<128x8xf32, #tpu.memory_space<vmem>>, vector<128x8xf32>
    %cst_22 = arith.constant dense<0.000000e+00> : vector<8x8xf32>
    %29 = tpu.matmul %27, %28, %cst_22 {dimension_numbers = #tpu.dot_dimension_numbers<[1], [0], [0], [1], [0, 0, 1, 1], [], []>, precision = #tpu.contract_precision<fp32>} : vector<8x128xf32>, vector<128x8xf32>, vector<8x8xf32> -> vector<8x8xf32>
    %c0_23 = arith.constant 0 : index
    %c0_24 = arith.constant 0 : index
    %30 = vector.load %arg9[%c0_23, %c0_24] : memref<128x8xf32, #tpu.memory_space<vmem>>, vector<128x8xf32>
    %cst_25 = arith.constant dense<0.000000e+00> : vector<8x8xf32>
    %31 = tpu.matmul %27, %30, %cst_25 {dimension_numbers = #tpu.dot_dimension_numbers<[1], [0], [0], [1], [0, 0, 1, 1], [], []>, precision = #tpu.contract_precision<fp32>} : vector<8x128xf32>, vector<128x8xf32>, vector<8x8xf32> -> vector<8x8xf32>
    %32 = arith.mulf %0, %29 : vector<8x8xf32>
    %33 = arith.subf %32, %31 : vector<8x8xf32>
    %cst_26 = arith.constant 6.250000e-02 : f32
    %34 = vector.broadcast %cst_26 : f32 to vector<8x8xf32>
    %35 = arith.mulf %34, %33 : vector<8x8xf32>
    %c0_27 = arith.constant 0 : index
    %c0_28 = arith.constant 0 : index
    %36 = vector.load %arg11[%c0_27, %c0_28] : memref<8x8xf32, #tpu.memory_space<vmem>>, vector<8x8xf32>
    tpu.vector_store %arg11[%c0_27, %c0_28], %35 {strides = array<i32>} : memref<8x8xf32, #tpu.memory_space<vmem>>, vector<8x8xf32>,
    return
  }
  func.func @transform_0(%arg0: i32) -> (i32, i32) {
    %c0_i32 = arith.constant 0 : i32
    %c0_i32_0 = arith.constant 0 : i32
    return %arg0, %c0_i32 : i32, i32
  }
  func.func @transform_1(%arg0: i32) -> (i32, i32) {
    %c0_i32 = arith.constant 0 : i32
    %c0_i32_0 = arith.constant 0 : i32
    %c0_i32_1 = arith.constant 0 : i32
    return %c0_i32, %c0_i32_0 : i32, i32
  }
  func.func @transform_2(%arg0: i32) -> (i32, i32) {
    %c0_i32 = arith.constant 0 : i32
    %c0_i32_0 = arith.constant 0 : i32
    %c0_i32_1 = arith.constant 0 : i32
    return %c0_i32, %c0_i32_0 : i32, i32
  }
  func.func @transform_3(%arg0: i32) -> (i32, i32) {
    %c0_i32 = arith.constant 0 : i32
    %c0_i32_0 = arith.constant 0 : i32
    %c0_i32_1 = arith.constant 0 : i32
    return %c0_i32, %c0_i32_0 : i32, i32
  }
  func.func @transform_4(%arg0: i32) -> (i32, i32) {
    %c0_i32 = arith.constant 0 : i32
    %c0_i32_0 = arith.constant 0 : i32
    %c0_i32_1 = arith.constant 0 : i32
    return %c0_i32, %c0_i32_0 : i32, i32
  }
  func.func @transform_5(%arg0: i32) -> (i32, i32) {
    %c0_i32 = arith.constant 0 : i32
    %c0_i32_0 = arith.constant 0 : i32
    %c0_i32_1 = arith.constant 0 : i32
    return %c0_i32, %c0_i32_0 : i32, i32
  }
  func.func @transform_6(%arg0: i32) -> (i32, i32) {
    %c0_i32 = arith.constant 0 : i32
    %c0_i32_0 = arith.constant 0 : i32
    %c0_i32_1 = arith.constant 0 : i32
    return %c0_i32, %c0_i32_0 : i32, i32
  }
  func.func @transform_7(%arg0: i32) -> (i32, i32) {
    %c0_i32 = arith.constant 0 : i32
    %c0_i32_0 = arith.constant 0 : i32
    %c0_i32_1 = arith.constant 0 : i32
    return %c0_i32, %c0_i32_0 : i32, i32
  }
  func.func @transform_8(%arg0: i32) -> (i32, i32) {
    %c0_i32 = arith.constant 0 : i32
    %c0_i32_0 = arith.constant 0 : i32
    %c0_i32_1 = arith.constant 0 : i32
    return %c0_i32, %c0_i32_0 : i32, i32
  }
  func.func @transform_9(%arg0: i32) -> (i32, i32) {
    %c0_i32 = arith.constant 0 : i32
    %c0_i32_0 = arith.constant 0 : i32
    return %arg0, %c0_i32 : i32, i32
  }
  func.func @transform_10(%arg0: i32) -> (i32, i32) {
    %c0_i32 = arith.constant 0 : i32
    %c0_i32_0 = arith.constant 0 : i32
    return %arg0, %c0_i32 : i32, i32
  }
}

</mosaic_0001>

<bundles_post_ra>
// kernel: tpu_custom_call.1
= control target key start
LH: loop header
LB: loop body
LE: loop exit
PB: predicated region body
PF: predicated region fallthrough
CT: control target
= control target key end

     0   :  { %s2737_s0 = inlined_call_operand.vmem [shape: f32[16,8], index: 0, kind: input, shape index: {}]   ;;  %s2738_s1 = inlined_call_operand.vmem [shape: f32[8,128], index: 1, kind: input, shape index: {}]   ;;  %s2739_s2 = inlined_call_operand.vmem [shape: f32[8,128], index: 2, kind: input, shape index: {}]   ;;  %s2740_s3 = inlined_call_operand.vmem [shape: f32[1,128], index: 3, kind: input, shape index: {}]   ;;  %s2741_s4 = inlined_call_operand.vmem [shape: f32[8,128], index: 4, kind: input, shape index: {}]   ;;  %s2742_s5 = inlined_call_operand.vmem [shape: f32[8,128], index: 5, kind: input, shape index: {}]   ;;  %s2743_s6 = inlined_call_operand.vmem [shape: f32[1,128], index: 6, kind: input, shape index: {}]   ;;  %s2744_s7 = inlined_call_operand.vmem [shape: f32[128,8], index: 7, kind: input, shape index: {}]   ;;  %s2745_s8 = inlined_call_operand.vmem [shape: f32[128,8], index: 8, kind: input, shape index: {}]   ;;  %s2746_s9 = inlined_call_operand.hbm [shape: f32[16,128], index: 9, kind: output, shape index: {0}]   ;;  %s2747_s10 = inlined_call_operand.vmem [shape: f32[16,8], index: 10, kind: output, shape index: {1}]  }
   0x1   :  { %2757 = sst [smem:[#allocation5_spill]] %s2737_s0 }
   0x2   :  { %2758 = sst [smem:[#allocation6_spill]] %s2738_s1 }
   0x3   :  { %2759 = sst [smem:[#allocation7_spill]] %s2739_s2 }
   0x4   :  { %2760 = sst [smem:[#allocation8_spill]] %s2740_s3 }
   0x5   :  { %2761 = sst [smem:[#allocation9_spill]] %s2741_s4 }
   0x6   :  { %16 = vsyncpa [#allocation3], 0 }
   0x7   :  { %18 = vsyncpa [#allocation3 + $0x1], 0  ;;  %s1996_s13 = smov 0   ;;  %s1998_s14 = smov 0  }
   0x8   :  { %s2000_s15 = smov 0   ;;  %s2002_s16 = smov 0  }
   0x9 LB: > { %s2017_s17 = sadd.s32 4294967295, %s1939_s16   ;;  %s1820_s18 = sadd.s32 4294967294, %s1939_s16   ;;  %s1939_s16 = sphi %s2002_s16, %s2781_s16   ;;  %s1935_s15 = sphi %s2000_s15, %s2780_s15   ;;  %s1931_s14 = sphi %s1998_s14, %s2779_s14   ;;  %s1927_s13 = sphi %s1996_s13, %s2778_s13  }
   0xa   : > { %s2021_s19 = sadd.s32 1, %s1939_s16   ;;  %s225_s20 = sadd.s32 1, %s1935_s15 }
   0xb   : > { %s222_s21 = ssub.s32 %s1939_s16, %s2021_s19  ;;  %p235_p0 = scmp.ne.s32.totalorder %s1935_s15, %s1931_s14 }
   0xc   : > { %p223_p1 = scmp.eq.s32.totalorder %s222_s21, 0  ;;  %p236_p2 = scmp.eq.s32.totalorder %s2017_s17, 1 }
   0xd   : > { %p241_p3 = scmp.ne.s32.totalorder %s1931_s14, %s1927_s13  ;;  %p242_p4 = scmp.eq.s32.totalorder %s1820_s18, 1 }
   0xe   : > { %s2032_s22 = scalar_select %p223_p1, %s1935_s15, %s225_s20  }
   0xf   : > { %p2034_p5 = por %p236_p2, %p235_p0  ;;  %p2038_p6 = por %p242_p4, %p241_p3 }
  0x10   : > { %p1823_p7 = scmp.ge.s32.totalorder %s1939_s16, 1  ;;  %p317_p8 = scmp.lt.s32.totalorder %s1939_s16, 3 }
  0x12   : > { %p318_p9 = pnand %p1823_p7, %p317_p8 }
  0x13   : > { %s2764_s2 = sld [smem:[#allocation7_spill]] (!%p318_p9)  ;;  %p358_p10 = scmp.lt.s32.totalorder (!%p318_p9), %s2017_s17, 1 }
  0x14   : > { %321 = sbr.rel (%p318_p9) target bundleno = 662 (0x296), region = 56  ;;  %s2765_s1 = sld [smem:[#allocation6_spill]] (!%p318_p9) }
  0x15   : > { %s2766_s0 = sld [smem:[#allocation5_spill]] (!%p318_p9)  ;;  %s2749_s27 = sand.u32 (!%p318_p9), 1, %s1931_s14  }
  0x16   : > { %s2767_s4 = sld [smem:[#allocation9_spill]] (!%p318_p9)  ;;  %s2083_s30 = sshll.u32 (!%p318_p9), %s2749_s27, 3 }
  0x17   : > { %s2768_s3 = sld [smem:[#allocation8_spill]] (!%p318_p9)  ;;  %s2750_s18 = scalar_lea.vmem (!%p318_p9), [#allocation2], %s2083_s30 }
  0x18   : > { %s1828_s26 = sshll.u32 (!%p318_p9), %s2017_s17, 3  ;;  %s2775_s27 = scalar_lea.vmem (!%p318_p9), [#allocation2], %s2083_s30 }
  0x19   : > { %v369_v0 = vld [vmem:[%s2764_s2] sm:$0xff]  ;;  %s2057_s11 = scalar_select %p358_p10, %s2017_s17, 1  ;;  %vm370_vm0 = vcmask 64512  }
  0x1a   : > { %v368_v1 = vld [vmem:[%s2765_s1] sm:$0xff]  ;;  %v389_v3 = vand.u32 4294901760, %v369_v0  ;;  %s1729_s29 = scalar_lea.hbm %s2746_s9, %s1828_s26  ;;  %s2776_s25 = sand.u32 1, %s1931_s14  }
  0x1b   : > { %v676_v2 = vld [vmem:[%s2742_s5] sm:$0xff]  ;;  %v538_v4 = vand.u32 4294901760, %v368_v1  ;;  %s2748_s12 = sshll.u32 %s2057_s11, 3  ;;  %s1733_s20 = sshll.u32 %s1729_s29, 4  ;;  %s1734_s20 = int_to_ptr.hbm [resolvable:$true] %s1733_s20 }
  0x1c   : > { %v2054_v5 = vand.u32 4294901760, %v676_v2  ;;  %v416_v6 = vsub.f32 %v369_v0, %v389_v3  ;;  %466 = vmatpush.msra.mxu3 %v389_v3  ;;  %390 = vmatpush.msra.mxu0 %v389_v3  ;;  %s2065_s21 = scalar_lea.vmem %s2766_s0, %s2748_s12  ;;  %v675_v17 = vld [vmem:[%s2767_s4] sm:$0xff]  ;;  %s1715_s0 = scalar_lea.sflag [#allocation3], %s2776_s25 }
  0x1d   : > { %v565_v7 = vsub.f32 %v368_v1, %v538_v4  ;;  %v366_v11 = vld [vmem:[%s2065_s21] sm:$0xff]  ;;  %v838_v24 = vand.u32 4294901760, %v675_v17  ;;  %s1891_s1 = sshra.s32 %s1734_s20, 4  ;;  %s1897_s4 = scalar_lea.hbm %s2746_s9, 16  ;;  %s1892_s1 = int_to_ptr.hbm [resolvable:$true] %s1891_s1 }
  0x1e   : > { %443 = vmatpush.msra.mxu2 %v416_v6  ;;  %v417_v8 = vand.u32 4294901760, %v416_v6  ;;  %v719_v10 = vsub.f32 %v676_v2, %v2054_v5  ;;  %v367_v12 = vmul.f32 %v366_v11, %v366_v11  ;;  %v372_v13 = vsel %vm370_vm0, %v366_v11, 0  ;;  %v1870_v60 = vld [vmem:[%s2768_s3] ss:$0 sm:$0xff]  ;;  %s1893_s2 = scalar_lea.hbm %s1892_s1, 8  ;;  %p1898_p0 = scmp.lt.s32.totalorder %s1892_s1, %s2746_s9 }
  0x1f   : > { %v566_v9 = vand.u32 4294901760, %v565_v7  ;;  %v391_v16 = vand.u32 4294901760, %v372_v13  ;;  %v865_v30 = vsub.f32 %v675_v17, %v838_v24  ;;  %p1894_p11 = scmp.ne.s32.totalorder %s1892_s1, %s1893_s2  ;;  %p1899_p1 = scmp.lt.s32.totalorder %s1897_s4, %s1893_s2 }
  0x20   : > { %539 = vmatpush.msrb.mxu2 %v538_v4  ;;  %v418_v14 = vsub.f32 %v416_v6, %v417_v8  ;;  %492 = vmatpush.msrb.mxu0 %v417_v8  ;;  %v521_v18 = vsel %vm370_vm0, %v367_v12, 0  ;;  %v720_v21 = vand.u32 4294901760, %v719_v10 }
  0x21   : > { %v567_v15 = vsub.f32 %v565_v7, %v566_v9  ;;  %v392_v22 = vsub.f32 %v372_v13, %v391_v16  ;;  %v540_v23 = vand.u32 4294901760, %v521_v18  ;;  %v866_v35 = vand.u32 4294901760, %v865_v30  ;;  %p1895_p12 = pnand %p1894_p11, %p2034_p5  ;;  %p1900_p2 = por %p1899_p1, %p1898_p0 }
  0x22   : > { %v419_v19 = vand.u32 4294901760, %v418_v14  ;;  %v721_v27 = vsub.f32 %v719_v10, %v720_v21 }
  0x23   : > { %v568_v20 = vand.u32 4294901760, %v567_v15  ;;  %446 = vmatmul.f32.vlgmr.msra.gmra.mxu2 %v392_v22  ;;  %v393_v25 = vand.u32 4294901760, %v392_v22  ;;  %v541_v26 = vsub.f32 %v521_v18, %v540_v23  ;;  %v867_v36 = vsub.f32 %v865_v30, %v866_v35  ;;  %p1896_p13 = pneg %p1895_p12 }
  0x24   : > { %420 = vmatpush.msra.mxu1 %v419_v19  ;;  %641 = vmatpush.msra.mxu2 %v566_v9  ;;  %v722_v33 = vand.u32 4294901760, %v721_v27 }
  0x25   : > { %569 = vmatpush.msrb.mxu3 %v568_v20  ;;  %422 = vmatmul.f32.vlgmr.msra.gmra.mxu1 %v391_v16  ;;  %v394_v28 = vsub.f32 %v392_v22, %v393_v25  ;;  %v542_v29 = vand.u32 4294901760, %v541_v26  ;;  %v868_v37 = vand.u32 4294901760, %v867_v36  ;;  %v1005_v36 = vld [vmem:[%s2744_s7 + $0x48] sm:$0xff]  ;;  %p1901_p3 = pnand %p1900_p2, %p1896_p13 }
  0x26   : > { %514 = vmatpush.msrb.mxu1 %v389_v3  ;;  %470 = vmatmul.f32.vlgmr.msra.gmra.mxu3 %v393_v25 }
  0x27   : > { %663 = vmatpush.msra.mxu3 %v538_v4  ;;  %v395_v31 = vand.u32 4294901760, %v394_v28  ;;  %v543_v32 = vsub.f32 %v541_v26, %v542_v29 }
  0x28   : > { %615 = vmatpush.msra.mxu1 %v538_v4 }
  0x29   : > { %396 = vmatmul.f32.vlgmr.msra.gmra.mxu0 %v395_v31  ;;  %v544_v34 = vand.u32 4294901760, %v543_v32  ;;  %v1006_v32 = vld [vmem:[%s2744_s7 + $0x50] sm:$0xff] }
  0x2a   : > { %592 = vmatpush.msra.mxu0 %v565_v7 }
  0x2b   : > { %545 = vmatmul.f32.vlgmr.msrb.gmra.mxu2 %v544_v34 }
  0x2c   : > { %746 = vmatpush.msrb.mxu2 %v719_v10 }
  0x2d   : > { %516 = vmatmul.f32.vlgmr.msrb.gmra.mxu1 %v391_v16 }
  0x2e   : > { %723 = vmatpush.msrb.mxu1 %v722_v33  ;;  %571 = vmatmul.f32.vlgmr.msrb.gmra.mxu3 %v540_v23 }
  0x2f   : > { %769 = vmatpush.msrb.mxu3 %v2054_v5 }
  0x31   : > { %494 = vmatmul.f32.vlgmr.msrb.gmra.mxu0 %v391_v16 }
  0x32   : > { %693 = vmatpush.msrb.mxu0 %v2054_v5 }
  0x33   : > { %643 = vmatmul.f32.vlgmr.msra.gmra.mxu2 %v540_v23 }
  0x34   : > { %839 = vmatpush.msra.mxu2 %v838_v24 }
  0x35   : > { %619 = vmatmul.f32.vlgmr.msra.gmra.mxu1 %v542_v29 }
  0x36   : > { %817 = vmatpush.msra.mxu1 %v2054_v5  ;;  %665 = vmatmul.f32.vlgmr.msra.gmra.mxu3 %v540_v23 }
  0x37   : > { %869 = vmatpush.msra.mxu3 %v868_v37  ;;  %v1004_v37 = vld [vmem:[%s2744_s7 + $0x40] sm:$0xff] }
  0x39   : > { %595 = vmatmul.f32.vlgmr.msra.gmra.mxu0 %v541_v26 }
  0x3a   : > { %795 = vmatpush.msra.mxu0 %v720_v21  ;;  %v1871_v21 = vld [vmem:[%s2743_s6] ss:$0 sm:$0xff] }
  0x3b   : > { %749 = vmatmul.f32.vlgmr.msrb.gmra.mxu2 %v392_v22 }
  0x3c   : > { %941 = vmatpush.msrb.mxu2 %v866_v35  ;;  %v2122_v35 = vand.u32 4294901760, %v1006_v32 }
  0x3d   : > { %725 = vmatmul.f32.vlgmr.msrb.gmra.mxu1 %v391_v16 }
  0x3e   : > { %915 = vmatpush.msrb.mxu1 %v838_v24  ;;  %773 = vmatmul.f32.vlgmr.msrb.gmra.mxu3 %v393_v25  ;;  %v1010_v25 = vld [vmem:[%s2744_s7 + $0x70] sm:$0xff] }
  0x3f   : > { %963 = vmatpush.msrb.mxu3 %v838_v24  ;;  %v1011_v24 = vld [vmem:[%s2744_s7 + $0x78] sm:$0xff]  ;;  %v2105_v28 = vand.u32 4294901760, %v1010_v25 }
  0x40   : > { %v2103_v27 = vand.u32 4294901760, %v1011_v24 }
  0x41   : > { %699 = vmatmul.f32.vlgmr.msrb.gmra.mxu0 %v395_v31  ;;  %v1007_v31 = vld [vmem:[%s2744_s7 + $0x58] sm:$0xff] }
  0x42   : > { %892 = vmatpush.msrb.mxu0 %v865_v30  ;;  %v1008_v30 = vld [vmem:[%s2744_s7 + $0x60] sm:$0xff] }
  0x43   : > { %845 = vmatmul.f32.vlgmr.msra.gmra.mxu2 %v544_v34  ;;  %v2118_v33 = vand.u32 4294901760, %v1008_v30  ;;  %v2120_v34 = vand.u32 4294901760, %v1007_v31 }
  0x45   : > { %819 = vmatmul.f32.vlgmr.msra.gmra.mxu1 %v391_v16 }
  0x46   : > { %871 = vmatmul.f32.vlgmr.msra.gmra.mxu3 %v540_v23 }
  0x47   : > { %1209 = vmatpush.msra.mxu3 %v2103_v27 }
  0x49   : > { %797 = vmatmul.f32.vlgmr.msra.gmra.mxu0 %v391_v16  ;;  %1211 = vmatpush.msra.mxu3 %v2105_v28 }
  0x4a   : > { %1013 = vmatpush.msra.mxu0 %v2103_v27 }
  0x4b   : > { %943 = vmatmul.f32.vlgmr.msrb.gmra.mxu2 %v540_v23 }
  0x4c   : > { %1015 = vmatpush.msra.mxu0 %v2105_v28 }
  0x4d   : > { %919 = vmatmul.f32.vlgmr.msrb.gmra.mxu1 %v542_v29 }
  0x4e   : > { %965 = vmatmul.f32.vlgmr.msrb.gmra.mxu3 %v540_v23 }
  0x51   : > { %895 = vmatmul.f32.vlgmr.msrb.gmra.mxu0 %v541_v26  ;;  %v1009_v26 = vld [vmem:[%s2744_s7 + $0x68] sm:$0xff] }
  0x52   : > { %v2107_v29 = vand.u32 4294901760, %v1009_v26 }
  0x54   : > { %1213 = vmatpush.msra.mxu3 %v2107_v29  ;;  %1017 = vmatpush.msra.mxu0 %v2107_v29 }
  0x56   : > { %1215 = vmatpush.msra.mxu3 %v2118_v33  ;;  %1019 = vmatpush.msra.mxu0 %v2118_v33 }
  0x58   : > { %1217 = vmatpush.msra.mxu3 %v2120_v34  ;;  %1021 = vmatpush.msra.mxu0 %v2120_v34 }
  0x5a   : > { %1219 = vmatpush.msra.mxu3 %v2122_v35  ;;  %1023 = vmatpush.msra.mxu0 %v2122_v35 }
  0xa2   : > { %v423_v38 = vpop.f32.mrf.mxu1 }
  0xa6   : > { %v397_v39 = vpop.f32.mrf.mxu0  ;;  %v447_v40 = vpop.f32.mrf.mxu2 }
  0xa7   : > { %v424_v41 = vadd.f32 %v423_v38, %v397_v39  ;;  %v2131_v38 = vsub.f32 %v1011_v24, %v2103_v27  ;;  %v2134_v39 = vsub.f32 %v1010_v25, %v2105_v28 }
  0xa9   : > { %v471_v42 = vpop.f32.mrf.mxu3  ;;  %v448_v44 = vadd.f32 %v447_v40, %v424_v41  ;;  %v2137_v40 = vsub.f32 %v1009_v26, %v2107_v29  ;;  %v2141_v41 = vand.u32 4294901760, %v1005_v36  ;;  %1156 = vmatpush.msra.mxu2 %v2131_v38  ;;  %v996_v26 = vld [vmem:[%s2744_s7] sm:$0xff] }
  0xaa   : > { %v517_v43 = vpop.f32.mrf.mxu1 }
  0xab   : > { %v472_v45 = vadd.f32 %v471_v42, %v448_v44  ;;  %v2144_v42 = vsub.f32 %v1008_v30, %v2118_v33  ;;  %v2149_v44 = vand.u32 4294901760, %v1004_v37  ;;  %1159 = vmatpush.msra.mxu2 %v2134_v39  ;;  %1221 = vmatpush.msra.mxu3 %v2141_v41 }
  0xac   : > { %1025 = vmatpush.msra.mxu0 %v2141_v41 }
  0xad   : > { %1162 = vmatpush.msra.mxu2 %v2137_v40  ;;  %1223 = vmatpush.msra.mxu3 %v2149_v44 }
  0xae   : > { %v495_v46 = vpop.f32.mrf.mxu0  ;;  %v546_v47 = vpop.f32.mrf.mxu2  ;;  %1027 = vmatpush.msra.mxu0 %v2149_v44 }
  0xaf   : > { %v496_v48 = vadd.f32 %v495_v46, %v472_v45  ;;  %v1055_v45 = vand.u32 4294901760, %v2131_v38  ;;  %v1061_v46 = vand.u32 4294901760, %v2134_v39  ;;  %1165 = vmatpush.msra.mxu2 %v2144_v42 }
  0xb1   : > { %v572_v49 = vpop.f32.mrf.mxu3  ;;  %v518_v50 = vadd.f32 %v517_v43, %v496_v48  ;;  %v2147_v43 = vsub.f32 %v1007_v31, %v2120_v34  ;;  %v2157_v48 = vsub.f32 %v1006_v32, %v2122_v35 }
  0xb2   : > { %v620_v51 = vpop.f32.mrf.mxu1 }
  0xb3   : > { %v547_v52 = vadd.f32 %v546_v47, %v518_v50  ;;  %v1067_v47 = vand.u32 4294901760, %v2137_v40  ;;  %v1079_v50 = vand.u32 4294901760, %v2147_v43  ;;  %1168 = vmatpush.msra.mxu2 %v2147_v43 }
  0xb5   : > { %v573_v53 = vadd.f32 %v572_v49, %v547_v52  ;;  %v1073_v49 = vand.u32 4294901760, %v2144_v42  ;;  %v1056_v52 = vsub.f32 %v2131_v38, %v1055_v45  ;;  %1171 = vmatpush.msra.mxu2 %v2157_v48 }
  0xb6   : > { %v596_v54 = vpop.f32.mrf.mxu0  ;;  %v644_v55 = vpop.f32.mrf.mxu2 }
  0xb7   : > { %v597_v56 = vadd.f32 %v596_v54, %v573_v53  ;;  %v1062_v53 = vsub.f32 %v2134_v39, %v1061_v46  ;;  %v1068_v54 = vsub.f32 %v2137_v40, %v1067_v47  ;;  %v1363_v39 = vld [vmem:[%s2745_s8 + $0x50] sm:$0xff] }
  0xb9   : > { %v666_v57 = vpop.f32.mrf.mxu3  ;;  %v621_v58 = vadd.f32 %v620_v51, %v597_v56  ;;  %v2163_v51 = vsub.f32 %v1005_v36, %v2141_v41  ;;  %v1003_v56 = vld [vmem:[%s2744_s7 + $0x38] sm:$0xff] }
  0xba   : > { %v726_v61 = vpop.f32.mrf.mxu1  ;;  %v1368_v36 = vld [vmem:[%s2745_s8 + $0x78] sm:$0xff] }
  0xbb   : > { %v645_v59 = vadd.f32 %v644_v55, %v621_v58  ;;  %v2178_v55 = vsub.f32 %v1004_v37, %v2149_v44  ;;  %v1001_v58 = vld [vmem:[%s2744_s7 + $0x28] sm:$0xff]  ;;  %1174 = vmatpush.msra.mxu2 %v2163_v51  ;;  %v1367_v37 = vld [vmem:[%s2745_s8 + $0x70] sm:$0xff] }
  0xbd   : > { %v667_v62 = vadd.f32 %v666_v57, %v645_v59  ;;  %v1002_v57 = vld [vmem:[%s2744_s7 + $0x30] sm:$0xff]  ;;  %v1057_v59 = vand.u32 4294901760, %v1056_v52  ;;  %1177 = vmatpush.msra.mxu2 %v2178_v55 }
  0xbe   : > { %v700_v63 = vpop.f32.mrf.mxu0  ;;  %v750_v0 = vpop.f32.mrf.mxu2 }
  0xbf   : > { %v673_v1 = vadd.f32 %v1870_v60, %v667_v62  ;;  %v727_v2 = vadd.f32 %v726_v61, %v700_v63  ;;  %v1063_v60 = vand.u32 4294901760, %v1062_v53  ;;  %v1074_v61 = vsub.f32 %v2144_v42, %v1073_v49  ;;  %v1000_v63 = vld [vmem:[%s2744_s7 + $0x20] sm:$0xff]  ;;  %1058 = vmatpush.msra.mxu1 %v1057_v59 }
  0xc0   : > { %v1085_v62 = vand.u32 4294901760, %v2157_v48 }
  0xc1   : > { %v774_v3 = vpop.f32.mrf.mxu3  ;;  %v751_v4 = vadd.f32 %v750_v0, %v727_v2  ;;  %674 = vst [vmem:[%s2750_s18] sm:$0xff] %v673_v1  ;;  %v1080_v0 = vsub.f32 %v2147_v43, %v1079_v50  ;;  %v1091_v1 = vand.u32 4294901760, %v2163_v51  ;;  %v1069_v2 = vand.u32 4294901760, %v1068_v54  ;;  %1064 = vmatpush.msra.mxu1 %v1063_v60  ;;  %v1366_v54 = vld [vmem:[%s2745_s8 + $0x68] sm:$0xff]  ;;  %s1731_s18 = sshll.u32 %s2775_s27, 4  ;;  %s1732_s18 = int_to_ptr.vmem [resolvable:$true] %s1731_s18 }
  0xc2   : > { %v820_v5 = vpop.f32.mrf.mxu1  ;;  %v2288_v60 = vand.u32 4294901760, %v996_v26  ;;  %v1362_v43 = vld [vmem:[%s2745_s8 + $0x48] sm:$0xff] }
  0xc3   : > { %v775_v6 = vadd.f32 %v774_v3, %v751_v4  ;;  %v2204_v3 = vand.u32 4294901760, %v1003_v56  ;;  %v2206_v4 = vand.u32 4294901760, %v1002_v57  ;;  %1070 = vmatpush.msra.mxu1 %v1069_v2  ;;  %v2297_v2 = vand.u32 4294901760, %v1367_v37 }
  0xc5   : > { %1225 = vmatpush.msra.mxu3 %v2204_v3  ;;  %1029 = vmatpush.msra.mxu0 %v2204_v3 }
  0xc6   : > { %v798_v7 = vpop.f32.mrf.mxu0  ;;  %v846_v8 = vpop.f32.mrf.mxu2 }
  0xc7   : > { %v799_v9 = vadd.f32 %v798_v7, %v775_v6  ;;  %v999_v6 = vld [vmem:[%s2744_s7 + $0x18] sm:$0xff]  ;;  %v1097_v7 = vand.u32 4294901760, %v2178_v55  ;;  %1227 = vmatpush.msra.mxu3 %v2206_v4  ;;  %1031 = vmatpush.msra.mxu0 %v2206_v4 }
  0xc9   : > { %v872_v10 = vpop.f32.mrf.mxu3  ;;  %v821_v11 = vadd.f32 %v820_v5, %v799_v9  ;;  %v2208_v5 = vand.u32 4294901760, %v1001_v58  ;;  %v1075_v9 = vand.u32 4294901760, %v1074_v61 }
  0xca   : > { %v920_v15 = vpop.f32.mrf.mxu1 }
  0xcb   : > { %v847_v12 = vadd.f32 %v846_v8, %v821_v11  ;;  %v2216_v8 = vand.u32 4294901760, %v1000_v63  ;;  %v2223_v11 = vsub.f32 %v1003_v56, %v2204_v3  ;;  %1076 = vmatpush.msra.mxu1 %v1075_v9  ;;  %1229 = vmatpush.msra.mxu3 %v2208_v5 }
  0xcc   : > { %1033 = vmatpush.msra.mxu0 %v2208_v5 }
  0xcd   : > { %v873_v13 = vadd.f32 %v872_v10, %v847_v12  ;;  %v1086_v10 = vsub.f32 %v2157_v48, %v1085_v62  ;;  %v2226_v12 = vsub.f32 %v1002_v57, %v2206_v4  ;;  %1180 = vmatpush.msra.mxu2 %v2223_v11  ;;  %1231 = vmatpush.msra.mxu3 %v2216_v8  ;;  %v1361_v48 = vld [vmem:[%s2745_s8 + $0x40] sm:$0xff] }
  0xce   : > { %v896_v14 = vpop.f32.mrf.mxu0  ;;  %v944_v17 = vpop.f32.mrf.mxu2  ;;  %1035 = vmatpush.msra.mxu0 %v2216_v8 }
  0xcf   : > { %v897_v16 = vadd.f32 %v896_v14, %v873_v13  ;;  %v998_v13 = vld [vmem:[%s2744_s7 + $0x10] sm:$0xff]  ;;  %v2234_v14 = vsub.f32 %v1001_v58, %v2208_v5  ;;  %v1087_v24 = vand.u32 4294901760, %v1086_v10  ;;  %v1109_v25 = vand.u32 4294901760, %v2226_v12  ;;  %1183 = vmatpush.msra.mxu2 %v2226_v12 }
  0xd0   : > { %v2308_v10 = vand.u32 4294901760, %v1366_v54 }
  0xd1   : > { %v921_v18 = vadd.f32 %v920_v15, %v897_v16  ;;  %v966_v19 = vpop.f32.mrf.mxu3  ;;  %v2236_v15 = vand.u32 4294901760, %v999_v6  ;;  %v1081_v16 = vand.u32 4294901760, %v1080_v0  ;;  %v1115_v30 = vand.u32 4294901760, %v2234_v14  ;;  %1186 = vmatpush.msra.mxu2 %v2234_v14 }
  0xd2   : > { %v2295_v0 = vand.u32 4294901760, %v1368_v36 }
  0xd3   : > { %v945_v20 = vadd.f32 %v944_v17, %v921_v18  ;;  %v1092_v17 = vsub.f32 %v2163_v51, %v1091_v1  ;;  %v1103_v18 = vand.u32 4294901760, %v2223_v11  ;;  %v2265_v31 = vsub.f32 %v999_v6, %v2236_v15  ;;  %1082 = vmatpush.msra.mxu1 %v1081_v16  ;;  %1233 = vmatpush.msra.mxu3 %v2236_v15 }
  0xd4   : > { %v1116_v6 = vsub.f32 %v2234_v14, %v1115_v30  ;;  %1037 = vmatpush.msra.mxu0 %v2236_v15 }
  0xd5   : > { %v967_v22 = vadd.f32 %v966_v19, %v945_v20  ;;  %v997_v19 = vld [vmem:[%s2744_s7 + $0x8] sm:$0xff]  ;;  %v1098_v20 = vsub.f32 %v2178_v55, %v1097_v7  ;;  %v1093_v52 = vand.u32 4294901760, %v1092_v17  ;;  %v1104_v53 = vsub.f32 %v2223_v11, %v1103_v18  ;;  %1088 = vmatpush.msra.mxu1 %v1087_v24  ;;  %v1359_v11 = vld [vmem:[%s2745_s8 + $0x30] sm:$0xff] }
  0xd6   : > { %v2267_v32 = vand.u32 4294901760, %v997_v19  ;;  %v2752_v9 = vand.u32 4294901760, %v2265_v31  ;;  %v2312_v17 = vsub.f32 %v1368_v36, %v2295_v0  ;;  %v2470_v55 = vand.u32 4294901760, %v1361_v48 }
  0xd7   : > { %v2091_v23 = vadd.f32 %v1871_v21, %v967_v22  ;;  %v2252_v21 = vsub.f32 %v1000_v63, %v2216_v8  ;;  %v2254_v22 = vand.u32 4294901760, %v998_v13  ;;  %v1099_v57 = vand.u32 4294901760, %v1098_v20  ;;  %1094 = vmatpush.msra.mxu1 %v1093_v52 }
  0xd8   : > { %v1110_v63 = vsub.f32 %v2226_v12, %v1109_v25  ;;  %v1105_v16 = vand.u32 4294901760, %v1104_v53  ;;  %v2315_v20 = vsub.f32 %v1367_v37, %v2297_v2  ;;  %v2324_v52 = vsub.f32 %v1366_v54, %v2308_v10 }
  0xd9   : > { %974 = vmax.xlane.f32.xlu0 %v2091_v23  ;;  %v2754_v58 = vand.u32 4294901760, %v2252_v21  ;;  %v2286_v59 = vsub.f32 %v998_v13, %v2254_v22  ;;  %1100 = vmatpush.msra.mxu1 %v1099_v57  ;;  %v2751_v37 = vand.u32 4294901760, %v2312_v17  ;;  %v1117_v54 = vand.u32 4294901760, %v1116_v6 }
  0xda   : > { %v1111_v53 = vand.u32 4294901760, %v1110_v63  ;;  %1189 = vmatpush.msra.mxu2 %v2252_v21  ;;  %v1424_v63 = vand.u32 4294901760, %v2324_v52  ;;  %1235 = vmatpush.msra.mxu3 %v2254_v22 }
  0xdb   : > { %v2753_v24 = vand.u32 4294901760, %v2286_v59  ;;  %v1122_v36 = vsub.f32 %v2252_v21, %v2754_v58  ;;  %1106 = vmatpush.msra.mxu1 %v1105_v16  ;;  %1039 = vmatpush.msra.mxu0 %v2254_v22 }
  0xdc   : > { %1192 = vmatpush.msra.mxu2 %v2265_v31  ;;  %1237 = vmatpush.msra.mxu3 %v2267_v32  ;;  %v1425_v58 = vsub.f32 %v2324_v52, %v1424_v63 }
  0xdd   : > { %1112 = vmatpush.msra.mxu1 %v1111_v53  ;;  %v1123_v6 = vand.u32 4294901760, %v1122_v36  ;;  %1041 = vmatpush.msra.mxu0 %v2267_v32 }
  0xde   : > { %1195 = vmatpush.msra.mxu2 %v2286_v59  ;;  %1239 = vmatpush.msra.mxu3 %v2288_v60 }
  0xdf   : > { %1118 = vmatpush.msra.mxu1 %v1117_v54  ;;  %1043 = vmatpush.msra.mxu0 %v2288_v60 }
  0xe1   : > { %1124 = vmatpush.msra.mxu1 %v1123_v6  ;;  %1250 = vmatpush.msrb.mxu0 %v1055_v45 }
  0xe3   : > { %1254 = vmatpush.msrb.mxu0 %v1061_v46  ;;  %v2457_v46 = vand.u32 4294901760, %v1362_v43 }
  0xe5   : > { %1258 = vmatpush.msrb.mxu0 %v1067_v47 }
  0xe7   : > { %1262 = vmatpush.msrb.mxu0 %v1073_v49 }
  0xe9   : > { %1266 = vmatpush.msrb.mxu0 %v1079_v50 }
  0xeb   : > { %1270 = vmatpush.msrb.mxu0 %v1085_v62  ;;  %v2473_v62 = vsub.f32 %v1362_v43, %v2457_v46 }
  0xed   : > { %1274 = vmatpush.msrb.mxu0 %v1091_v1  ;;  %v1360_v1 = vld [vmem:[%s2745_s8 + $0x38] sm:$0xff] }
  0xef   : > { %1278 = vmatpush.msrb.mxu0 %v1097_v7  ;;  %v2485_v7 = vsub.f32 %v1361_v48, %v2470_v55 }
  0xf1   : > { %1282 = vmatpush.msrb.mxu0 %v1103_v18  ;;  %v1454_v14 = vand.u32 4294901760, %v2485_v7 }
  0xf3   : > { %1286 = vmatpush.msrb.mxu0 %v1109_v25  ;;  %v1455_v25 = vsub.f32 %v2485_v7, %v1454_v14 }
  0xf5   : > { %1290 = vmatpush.msrb.mxu0 %v1115_v30 }
 0x14c   : > { %v975_v56 = vpop.xlane.xlu0 %974 }
 0x14d   : > { %v976_v61 = vsub.f32 %v2091_v23, %v975_v56  ;;  %v2306_v23 = vsub.f32 %v997_v19, %v2267_v32  ;;  %v2321_v19 = vsub.f32 %v996_v26, %v2288_v60  ;;  %v2755_v26 = vand.u32 4294901760, %v2315_v20 }
 0x14e   : > { %v1128_v56 = vsub.f32 %v2265_v31, %v2752_v9 }
 0x14f   : > { %v977_v13 = vmul.f32 1.442695, %v976_v61  ;;  %v2756_v57 = vand.u32 4294901760, %v2306_v23  ;;  %v1413_v61 = vsub.f32 %v2312_v17, %v2751_v37  ;;  %v1145_v16 = vand.u32 4294901760, %v2321_v19  ;;  %1198 = vmatpush.msra.mxu2 %v2306_v23 }
 0x150   : > { %v1419_v37 = vsub.f32 %v2315_v20, %v2755_v26  ;;  %v1129_v53 = vand.u32 4294901760, %v1128_v56 }
 0x151   : > { %1872 = vpow2.f32 %v977_v13  ;;  %v1134_v13 = vsub.f32 %v2286_v59, %v2753_v24  ;;  %v1140_v36 = vsub.f32 %v2306_v23, %v2756_v57  ;;  %v1414_v24 = vand.u32 4294901760, %v1413_v61  ;;  %1201 = vmatpush.msra.mxu2 %v2321_v19 }
 0x152   : > { %v1146_v54 = vsub.f32 %v2321_v19, %v1145_v16  ;;  %v1420_v56 = vand.u32 4294901760, %v1419_v37  ;;  %1130 = vmatpush.msra.mxu1 %v1129_v53  ;;  %v1426_v61 = vand.u32 4294901760, %v1425_v58 }
 0x153   : > { %v1135_v26 = vand.u32 4294901760, %v1134_v13  ;;  %v1141_v57 = vand.u32 4294901760, %v1140_v36  ;;  %1370 = vmatpush.msrb.mxu2 %v2295_v0  ;;  %1415 = vmatpush.msrb.mxu3 %v1414_v24  ;;  %v1365_v13 = vld [vmem:[%s2745_s8 + $0x60] sm:$0xff] }
 0x154   : > { %v1147_v6 = vand.u32 4294901760, %v1146_v54  ;;  %v2382_v37 = vand.u32 4294901760, %v1365_v13 }
 0x155   : > { %1136 = vmatpush.msra.mxu1 %v1135_v26  ;;  %1372 = vmatpush.msrb.mxu2 %v2297_v2 }
 0x156   : > { %1421 = vmatpush.msrb.mxu3 %v1420_v56  ;;  %v2437_v38 = vsub.f32 %v1365_v13, %v2382_v37 }
 0x157   : > { %v2355_v9 = vpop.eup %1872  ;;  %1142 = vmatpush.msra.mxu1 %v1141_v57  ;;  %1374 = vmatpush.msrb.mxu2 %v2308_v10  ;;  %v1356_v57 = vld [vmem:[%s2745_s8 + $0x18] sm:$0xff] }
 0x158   : > { %979 = vadd.xlane.f32.xlu0 %v2355_v9  ;;  %1427 = vmatpush.msrb.mxu3 %v1426_v61  ;;  %v1430_v40 = vand.u32 4294901760, %v2437_v38  ;;  %v2534_v36 = vand.u32 4294901760, %v1356_v57  ;;  %v1355_v61 = vld [vmem:[%s2745_s8 + $0x10] sm:$0xff] }
 0x159   : > { %1148 = vmatpush.msra.mxu1 %v1147_v6  ;;  %1376 = vmatpush.msrb.mxu2 %v2382_v37 }
 0x15b   : > { %1317 = vmatpush.msrb.mxu1 %v2103_v27  ;;  %v2769_v27 = vand.u32 4294901760, %v2252_v21 }
 0x15d   : > { %1319 = vmatpush.msrb.mxu1 %v2105_v28  ;;  %1294 = vmatpush.msrb.mxu0 %v2769_v27  ;;  %v2770_v28 = vand.u32 4294901760, %v2265_v31  ;;  %v2545_v27 = vand.u32 4294901760, %v1355_v61 }
 0x15f   : > { %1321 = vmatpush.msrb.mxu1 %v2107_v29  ;;  %1298 = vmatpush.msrb.mxu0 %v2770_v28  ;;  %v2771_v29 = vand.u32 4294901760, %v2286_v59  ;;  %v1357_v59 = vld [vmem:[%s2745_s8 + $0x20] sm:$0xff]  ;;  %v2548_v28 = vsub.f32 %v1356_v57, %v2534_v36 }
 0x160   : > { %v2522_v19 = vand.u32 4294901760, %v1357_v59 }
 0x161   : > { %1323 = vmatpush.msrb.mxu1 %v2118_v33  ;;  %1302 = vmatpush.msrb.mxu0 %v2771_v29  ;;  %v2772_v33 = vand.u32 4294901760, %v2306_v23 }
 0x162   : > { %v2537_v54 = vsub.f32 %v1357_v59, %v2522_v19 }
 0x163   : > { %1325 = vmatpush.msrb.mxu1 %v2120_v34  ;;  %1306 = vmatpush.msrb.mxu0 %v2772_v33  ;;  %v1364_v34 = vld [vmem:[%s2745_s8 + $0x58] sm:$0xff]  ;;  %v1354_v33 = vld [vmem:[%s2745_s8 + $0x8] sm:$0xff] }
 0x164   : > { %v1478_v13 = vand.u32 4294901760, %v2537_v54  ;;  %v2561_v43 = vand.u32 4294901760, %v1354_v33 }
 0x165   : > { %1327 = vmatpush.msrb.mxu1 %v2122_v35  ;;  %1310 = vmatpush.msrb.mxu0 %v1145_v16  ;;  %v2434_v35 = vand.u32 4294901760, %v1364_v34 }
 0x167   : > { %1329 = vmatpush.msrb.mxu1 %v2141_v41  ;;  %1378 = vmatpush.msrb.mxu2 %v2434_v35  ;;  %v2444_v41 = vand.u32 4294901760, %v1363_v39  ;;  %v2447_v42 = vsub.f32 %v1364_v34, %v2434_v35  ;;  %v1479_v34 = vsub.f32 %v2537_v54, %v1478_v13 }
 0x169   : > { %1331 = vmatpush.msrb.mxu1 %v2149_v44  ;;  %v1431_v44 = vsub.f32 %v2437_v38, %v1430_v40  ;;  %1380 = vmatpush.msrb.mxu2 %v2444_v41  ;;  %v1436_v45 = vand.u32 4294901760, %v2447_v42  ;;  %v2460_v47 = vsub.f32 %v1363_v39, %v2444_v41  ;;  %v1484_v39 = vand.u32 4294901760, %v2548_v28 }
 0x16b   : > { %1333 = vmatpush.msrb.mxu1 %v2204_v3  ;;  %v1432_v49 = vand.u32 4294901760, %v1431_v44  ;;  %v1437_v50 = vsub.f32 %v2447_v42, %v1436_v45  ;;  %1382 = vmatpush.msrb.mxu2 %v2457_v46  ;;  %v1442_v51 = vand.u32 4294901760, %v2460_v47  ;;  %v2564_v44 = vsub.f32 %v1355_v61, %v2545_v27 }
 0x16d   : > { %1335 = vmatpush.msrb.mxu1 %v2206_v4  ;;  %1433 = vmatpush.msrb.mxu3 %v1432_v49  ;;  %v1438_v3 = vand.u32 4294901760, %v1437_v50  ;;  %v1443_v4 = vsub.f32 %v2460_v47, %v1442_v51  ;;  %v1480_v49 = vand.u32 4294901760, %v1479_v34  ;;  %v1485_v50 = vsub.f32 %v2548_v28, %v1484_v39 }
 0x16e   : > { %1384 = vmatpush.msrb.mxu2 %v2470_v55 }
 0x16f   : > { %1337 = vmatpush.msrb.mxu1 %v2208_v5  ;;  %v2482_v5 = vand.u32 4294901760, %v1360_v1  ;;  %1439 = vmatpush.msrb.mxu3 %v1438_v3  ;;  %v1444_v12 = vand.u32 4294901760, %v1443_v4  ;;  %v1353_v3 = vld [vmem:[%s2745_s8] sm:$0xff] }
 0x170   : > { %v2574_v4 = vand.u32 4294901760, %v1353_v3 }
 0x171   : > { %1339 = vmatpush.msrb.mxu1 %v2216_v8  ;;  %v1448_v8 = vand.u32 4294901760, %v2473_v62  ;;  %1386 = vmatpush.msrb.mxu2 %v2482_v5  ;;  %v2496_v18 = vsub.f32 %v1360_v1, %v2482_v5  ;;  %v1490_v1 = vand.u32 4294901760, %v2564_v44 }
 0x172   : > { %1445 = vmatpush.msrb.mxu3 %v1444_v12  ;;  %v1486_v12 = vand.u32 4294901760, %v1485_v50 }
 0x173   : > { %1341 = vmatpush.msrb.mxu1 %v2236_v15  ;;  %v2493_v15 = vand.u32 4294901760, %v1359_v11  ;;  %v1449_v21 = vsub.f32 %v2473_v62, %v1448_v8  ;;  %v1460_v30 = vand.u32 4294901760, %v2496_v18 }
 0x175   : > { %1343 = vmatpush.msrb.mxu1 %v2254_v22  ;;  %v1358_v22 = vld [vmem:[%s2745_s8 + $0x28] sm:$0xff]  ;;  %1388 = vmatpush.msrb.mxu2 %v2493_v15  ;;  %v1450_v58 = vand.u32 4294901760, %v1449_v21  ;;  %v1461_v23 = vsub.f32 %v2496_v18, %v1460_v30  ;;  %v1491_v21 = vsub.f32 %v2564_v44, %v1490_v1 }
 0x176   : > { %v2509_v31 = vand.u32 4294901760, %v1358_v22 }
 0x177   : > { %1345 = vmatpush.msrb.mxu1 %v2267_v32  ;;  %v2512_v32 = vsub.f32 %v1359_v11, %v2493_v15  ;;  %1451 = vmatpush.msrb.mxu3 %v1450_v58  ;;  %v1462_v16 = vand.u32 4294901760, %v1461_v23  ;;  %v2577_v11 = vsub.f32 %v1354_v33, %v2561_v43  ;;  %v1492_v58 = vand.u32 4294901760, %v1491_v21 }
 0x178   : > { %1390 = vmatpush.msrb.mxu2 %v2509_v31  ;;  %v2525_v26 = vsub.f32 %v1358_v22, %v2509_v31 }
 0x179   : > { %1347 = vmatpush.msrb.mxu1 %v2288_v60  ;;  %v1456_v60 = vand.u32 4294901760, %v1455_v25  ;;  %v1466_v24 = vand.u32 4294901760, %v2512_v32  ;;  %v1496_v22 = vand.u32 4294901760, %v2577_v11  ;;  %v2585_v25 = vsub.f32 %v1353_v3, %v2574_v4 }
 0x17a   : > { %1392 = vmatpush.msrb.mxu2 %v2522_v19  ;;  %v1472_v56 = vand.u32 4294901760, %v2525_v26 }
 0x17b   : > { %v1467_v53 = vsub.f32 %v2512_v32, %v1466_v24  ;;  %1457 = vmatpush.msrb.mxu3 %v1456_v60  ;;  %v1497_v59 = vsub.f32 %v2577_v11, %v1496_v22  ;;  %v1502_v60 = vand.u32 4294901760, %v2585_v25 }
 0x17c   : > { %1394 = vmatpush.msrb.mxu2 %v2534_v36  ;;  %v1473_v29 = vsub.f32 %v2525_v26, %v1472_v56 }
 0x17d   : > { %v1468_v6 = vand.u32 4294901760, %v1467_v53  ;;  %1463 = vmatpush.msrb.mxu3 %v1462_v16  ;;  %v1498_v23 = vand.u32 4294901760, %v1497_v59  ;;  %v1503_v57 = vsub.f32 %v2585_v25, %v1502_v60 }
 0x17e   : > { %1396 = vmatpush.msrb.mxu2 %v2545_v27  ;;  %v1474_v48 = vand.u32 4294901760, %v1473_v29 }
 0x17f   : > { %1469 = vmatpush.msrb.mxu3 %v1468_v6  ;;  %v1504_v16 = vand.u32 4294901760, %v1503_v57  ;;  %v2773_v57 = vand.u32 4294901760, %v2312_v17 }
 0x180   : > { %1398 = vmatpush.msrb.mxu2 %v2561_v43 }
 0x181   : > { %1475 = vmatpush.msrb.mxu3 %v1474_v48 }
 0x182   : > { %1400 = vmatpush.msrb.mxu2 %v2574_v4 }
 0x183   : > { %1481 = vmatpush.msrb.mxu3 %v1480_v49 }
 0x185   : > { %1487 = vmatpush.msrb.mxu3 %v1486_v12 }
 0x187   : > { %1493 = vmatpush.msrb.mxu3 %v1492_v58 }
 0x189   : > { %1499 = vmatpush.msrb.mxu3 %v1498_v23 }
 0x18b   : > { %1505 = vmatpush.msrb.mxu3 %v1504_v16  ;;  %v2774_v16 = vand.u32 4294901760, %v2315_v20 }
 0x1cb   : > { %v980_v53 = vpop.xlane.xlu0 %979 }
 0x1cc   : > { %1874 = vrcp.f32 %v980_v53  ;;  %v992_v33 = vand.u32 2147483648, %v980_v53  ;;  %v990_v48 = vand.u32 2147483647, %v980_v53  ;;  %vm986_vm2 = vweird.f32 %v980_v53 }
 0x1ce   : > { %v993_v50 = vor.u32 1.1754944e-38, %v992_v33  ;;  %vm991_vm4 = vcmp.eq.f32.partialorder %v990_v48, 8.507059e+37 }
 0x1d2   : > { %v1875_v61 = vpop.eup %1874 }
 0x1d3   : > { %v982_v6 = vmul.f32 %v1875_v61, %v980_v53  ;;  %vm987_vm1 = vweird.f32 %v1875_v61 }
 0x1d4   : > { %vm988_vm3 = vmor %vm986_vm2, %vm987_vm1 }
 0x1d5   : > { %v983_v29 = vsub.f32 1.0, %v982_v6 }
 0x1d7   : > { %v984_v34 = vmul.f32 %v1875_v61, %v983_v29 }
 0x1d9   : > { %v985_v49 = vadd.f32 %v1875_v61, %v984_v34 }
 0x1db   : > { %v989_v3 = vsel %vm988_vm3, %v1875_v61, %v985_v49 }
 0x1dc   : > { %v994_v12 = vsel %vm991_vm4, %v993_v50, %v989_v3 }
 0x1dd   : > { %v995_v21 = vmul.f32 %v2355_v9, %v994_v12 }
 0x1df   : > { %v2595_v58 = vand.u32 4294901760, %v995_v21 }
 0x1e1   : > { %1150 = vmatmul.f32.vlgmr.msra.gmra.mxu1 %v2595_v58  ;;  %v2599_v59 = vsub.f32 %v995_v21, %v2595_v58 }
 0x1e2   : > { %1566 = vmatpush.msra.mxu1 %v2295_v0 }
 0x1e3   : > { %1204 = vmatmul.f32.vlgmr.msra.gmra.mxu2 %v2599_v59  ;;  %v2604_v23 = vand.u32 4294901760, %v2599_v59 }
 0x1e4   : > { %1568 = vmatpush.msra.mxu1 %v2297_v2  ;;  %1607 = vmatpush.msra.mxu2 %v2773_v57 }
 0x1e5   : > { %1243 = vmatmul.f32.vlgmr.msra.gmra.mxu3 %v2604_v23  ;;  %v1047_v9 = vsub.f32 %v2599_v59, %v2604_v23 }
 0x1e6   : > { %1570 = vmatpush.msra.mxu1 %v2308_v10  ;;  %1611 = vmatpush.msra.mxu2 %v2774_v16 }
 0x1e7   : > { %1674 = vmatpush.msra.mxu3 %v2295_v0  ;;  %v1048_v53 = vand.u32 4294901760, %v1047_v9 }
 0x1e8   : > { %1572 = vmatpush.msra.mxu1 %v2382_v37  ;;  %1615 = vmatpush.msra.mxu2 %v1424_v63 }
 0x1e9   : > { %1676 = vmatpush.msra.mxu3 %v2297_v2  ;;  %1049 = vmatmul.f32.vlgmr.msra.gmra.mxu0 %v1048_v53 }
 0x1ea   : > { %1349 = vmatmul.f32.vlgmr.msrb.gmra.mxu1 %v2595_v58  ;;  %1513 = vmatpush.msra.mxu0 %v2312_v17 }
 0x1eb   : > { %1574 = vmatpush.msra.mxu1 %v2434_v35  ;;  %1619 = vmatpush.msra.mxu2 %v1430_v40 }
 0x1ec   : > { %1678 = vmatpush.msra.mxu3 %v2308_v10  ;;  %1406 = vmatmul.f32.vlgmr.msrb.gmra.mxu2 %v1048_v53 }
 0x1ed   : > { %1516 = vmatpush.msra.mxu0 %v2315_v20  ;;  %1576 = vmatpush.msra.mxu1 %v2444_v41 }
 0x1ee   : > { %1623 = vmatpush.msra.mxu2 %v1436_v45  ;;  %1680 = vmatpush.msra.mxu3 %v2382_v37 }
 0x1ef   : > { %1507 = vmatmul.f32.vlgmr.msrb.gmra.mxu3 %v2595_v58  ;;  %1519 = vmatpush.msra.mxu0 %v2324_v52 }
 0x1f0   : > { %1578 = vmatpush.msra.mxu1 %v2457_v46  ;;  %1627 = vmatpush.msra.mxu2 %v1442_v51 }
 0x1f1   : > { %1682 = vmatpush.msra.mxu3 %v2434_v35  ;;  %1522 = vmatpush.msra.mxu0 %v2437_v38 }
 0x1f2   : > { %1580 = vmatpush.msra.mxu1 %v2470_v55  ;;  %1631 = vmatpush.msra.mxu2 %v1448_v8 }
 0x1f3   : > { %1684 = vmatpush.msra.mxu3 %v2444_v41  ;;  %1312 = vmatmul.f32.vlgmr.msrb.gmra.mxu0 %v2595_v58 }
 0x1f4   : > { %1525 = vmatpush.msra.mxu0 %v2447_v42  ;;  %1582 = vmatpush.msra.mxu1 %v2482_v5 }
 0x1f5   : > { %1635 = vmatpush.msra.mxu2 %v1454_v14  ;;  %1686 = vmatpush.msra.mxu3 %v2457_v46 }
 0x1f6   : > { %1528 = vmatpush.msra.mxu0 %v2460_v47  ;;  %1584 = vmatpush.msra.mxu1 %v2493_v15 }
 0x1f7   : > { %1639 = vmatpush.msra.mxu2 %v1460_v30  ;;  %1688 = vmatpush.msra.mxu3 %v2470_v55 }
 0x1f8   : > { %1531 = vmatpush.msra.mxu0 %v2473_v62  ;;  %1586 = vmatpush.msra.mxu1 %v2509_v31 }
 0x1f9   : > { %1643 = vmatpush.msra.mxu2 %v1466_v24  ;;  %1690 = vmatpush.msra.mxu3 %v2482_v5 }
 0x1fa   : > { %1534 = vmatpush.msra.mxu0 %v2485_v7  ;;  %1588 = vmatpush.msra.mxu1 %v2522_v19 }
 0x1fb   : > { %1647 = vmatpush.msra.mxu2 %v1472_v56  ;;  %1692 = vmatpush.msra.mxu3 %v2493_v15 }
 0x1fc   : > { %1537 = vmatpush.msra.mxu0 %v2496_v18  ;;  %1590 = vmatpush.msra.mxu1 %v2534_v36 }
 0x1fd   : > { %1651 = vmatpush.msra.mxu2 %v1478_v13  ;;  %1694 = vmatpush.msra.mxu3 %v2509_v31 }
 0x1fe   : > { %1540 = vmatpush.msra.mxu0 %v2512_v32  ;;  %1592 = vmatpush.msra.mxu1 %v2545_v27 }
 0x1ff   : > { %1655 = vmatpush.msra.mxu2 %v1484_v39  ;;  %1696 = vmatpush.msra.mxu3 %v2522_v19 }
 0x200   : > { %1543 = vmatpush.msra.mxu0 %v2525_v26  ;;  %1594 = vmatpush.msra.mxu1 %v2561_v43 }
 0x201   : > { %1659 = vmatpush.msra.mxu2 %v1490_v1  ;;  %1698 = vmatpush.msra.mxu3 %v2534_v36 }
 0x202   : > { %1546 = vmatpush.msra.mxu0 %v2537_v54  ;;  %1596 = vmatpush.msra.mxu1 %v2574_v4 }
 0x203   : > { %1663 = vmatpush.msra.mxu2 %v1496_v22  ;;  %1700 = vmatpush.msra.mxu3 %v2545_v27 }
 0x204   : > { %1600 = vmatmul.f32.vlgmr.msra.gmra.mxu1 %v2604_v23  ;;  %1549 = vmatpush.msra.mxu0 %v2548_v28 }
 0x205   : > { %1667 = vmatpush.msra.mxu2 %v1502_v60  ;;  %1702 = vmatpush.msra.mxu3 %v2561_v43 }
 0x206   : > { %1669 = vmatmul.f32.vlgmr.msra.gmra.mxu2 %v2595_v58  ;;  %1552 = vmatpush.msra.mxu0 %v2564_v44 }
 0x207   : > { %1704 = vmatpush.msra.mxu3 %v2574_v4 }
 0x208   : > { %1706 = vmatmul.f32.vlgmr.msra.gmra.mxu3 %v2595_v58  ;;  %1555 = vmatpush.msra.mxu0 %v2577_v11 }
 0x20a   : > { %1558 = vmatpush.msra.mxu0 %v2585_v25 }
 0x20b   : > { %1561 = vmatmul.f32.vlgmr.msra.gmra.mxu0 %v2599_v59 }
 0x20c   : > { %1904 = shalt.err (!%p1901_p3)
}
 0x20d   : > { %1831 = dma.vmem_to_hbm [thread:$0]  (%p2034_p5), %s1732_s18, 128, %s1734_s20, %s1715_s0   ;;  %v1876_v14 = vld [vmem:[%s2065_s21] sm:$0xff] }
 0x20e   : > { %s2777_s0 = sshll.u32 %s2057_s11, 3 }
 0x20f   : > { %s365_s3 = scalar_lea.vmem %s2747_s10, %s2777_s0 }
 0x25e   : > { %v1151_v2 = vpop.f32.mrf.mxu1 }
 0x266   : > { %v1050_v0 = vpop.f32.mrf.mxu0  ;;  %v1205_v10 = vpop.f32.mrf.mxu2 }
 0x267   : > { %v1152_v20 = vadd.f32 %v1151_v2, %v1050_v0  ;;  %v1350_v37 = vpop.f32.mrf.mxu1 }
 0x268   : > { %v1244_v17 = vpop.f32.mrf.mxu3 }
 0x269   : > { %v1206_v63 = vadd.f32 %v1205_v10, %v1152_v20 }
 0x26b   : > { %v1245_v40 = vadd.f32 %v1244_v17, %v1206_v63 }
 0x26f   : > { %v1407_v35 = vpop.f32.mrf.mxu2 }
 0x270   : > { %v1313_v52 = vpop.f32.mrf.mxu0 }
 0x271   : > { %v1314_v41 = vadd.f32 %v1313_v52, %v1245_v40 }
 0x272   : > { %v1508_v38 = vpop.f32.mrf.mxu3 }
 0x273   : > { %v1509_v42 = vadd.f32 %v1508_v38, %v1407_v35  ;;  %v1351_v51 = vadd.f32 %v1350_v37, %v1314_v41 }
 0x275   : > { %v1710_v15 = vmul.f32 %v1876_v14, %v1351_v51 }
 0x281   : > { %v1601_v47 = vpop.f32.mrf.mxu1 }
 0x288   : > { %v1562_v45 = vpop.f32.mrf.mxu0 }
 0x289   : > { %v1563_v46 = vadd.f32 %v1562_v45, %v1509_v42  ;;  %v1670_v62 = vpop.f32.mrf.mxu2 }
 0x28b   : > { %v1602_v55 = vadd.f32 %v1601_v47, %v1563_v46  ;;  %v1707_v7 = vpop.f32.mrf.mxu3 }
 0x28d   : > { %v1671_v5 = vadd.f32 %v1670_v62, %v1602_v55 }
 0x28f   : > { %v1708_v8 = vadd.f32 %v1707_v7, %v1671_v5 }
 0x291   : > { %v1711_v18 = vsub.f32 %v1710_v15, %v1708_v8 }
 0x293   : > { %v1712_v30 = vmul.f32 0.0625, %v1711_v18 }
 0x295   : > { %1713 = vst.msk [vmem:[%s365_s3] sm:$0xff] %vm370_vm0, %v1712_v30 }
 0x296 PF: > { %p1837_p4 = scmp.ge.s32.totalorder %s1939_s16, 2  ;;  %s1748_s4 = sand.u32 1, %s1927_s13  }
 0x297   : > { %s1749_s23 = scalar_lea.sflag [#allocation3], %s1748_s4 }
 0x298   : > { %p1834_p5 = pnand %p1837_p4, %p2038_p6 }
 0x29a   : > { %p1835_p7 = pneg %p1834_p5 }
 0x29c   : > { %1922 = dma.done.wait (%p1835_p7), %s1749_s23, 128  }
 0x29d   : > { %1924 = vsyncadd (%p1835_p7), %s1749_s23, 4294967168  ;;  %p21_p8 = scmp.ge.s32.totalorder %s2021_s19, 4   ;;  %s2778_s13 = smov %s1931_s14 }
 0x29e   : > { %s2779_s14 = smov %s1935_s15  ;;  %s2780_s15 = smov %s2032_s22 }
 0x29f   : > { %s2781_s16 = smov %s2021_s19  ;;  %23 = sbr.rel (!%p21_p8) target bundleno = 9 (0x9), region = 103 }
 0x2a4   :  { %1762 = vsyncpa [#allocation3], 1 }
 0x2a5   :  { %1764 = vsyncpa [#allocation3 + $0x1], 1 }

</bundles_post_ra>
